<compile_context>
chip_gen: v5e
topology: v5e:2x2
jax: 0.10.0
libtpu: 0.0.40
codegen_flags: <defaults>
</compile_context>

<pallas_src>
import jax
import jax.numpy as jnp
from jax.experimental import pallas as pl
from jax.experimental.pallas import tpu as pltpu

EMB_DIM = 128        # module-level `emb_dim` in Siamese.py
BASE_OUT = 256       # synthetic base_net.fc.out_features


def margin_net_kernel(x_ref,        # (tm, tk)  matmul dtype (bf16/f32)
                      w_ref,        # (tk, F)   matmul dtype
                      b_ref,        # (1,  F)   f32   (folded conv+fc bias)
                      d1w_ref,      # (F,  E)   matmul dtype
                      d1b_ref,      # (1,  E)   f32
                      o_ref,        # (tm, E)   f32
                      acc_ref):     # (tm, F)   f32 scratch accumulator
    k = pl.program_id(1)

    @pl.when(k == 0)
    def _():
        acc_ref[...] = jnp.zeros_like(acc_ref)

    # Streaming K-reduction of the (conv-folded) base_net fc matmul.
    acc_ref[...] += jnp.dot(x_ref[...], w_ref[...],
                            preferred_element_type=jnp.float32)

    @pl.when(k == pl.num_programs(1) - 1)
    def _():
        h = acc_ref[...] + b_ref[...]                                    # (tm, F) f32
        e = jnp.dot(h.astype(d1w_ref.dtype), d1w_ref[...],
                    preferred_element_type=jnp.float32) + d1b_ref[...]   # (tm, E) f32
        # l2_norm: x / max(||x||_2, 1e-12)  ==  x * rsqrt(max(sum x^2, 1e-24))
        sumsq = jnp.sum(e * e, axis=1, keepdims=True)
        inv = jax.lax.rsqrt(jnp.maximum(sumsq, 1e-24))
        o_ref[...] = (e * inv).astype(o_ref.dtype)


def margin_net_forward(x_nchw, params, *, tm=128, tk=512, use_bf16=True):
    """x_nchw: (N, 1, H, W) float32 -> (N, EMB_DIM) float32 (L2-normalized rows)."""
    conv_w, conv_b, fc_w, fc_b, d1_w, d1_b = params
    N, C, H, W = x_nchw.shape
    assert C == 1, "MarginNet's first conv expects a single input channel"
    HW = H * W
    F, E = BASE_OUT, EMB_DIM
    mat_dt = jnp.bfloat16 if use_bf16 else jnp.float32

    x2d = x_nchw.reshape(N, HW).astype(jnp.float32)

    # ---- Fold the 1x1 conv (1->3 channels) into the fc weights/bias (exact) ----
    fc_w3 = fc_w.reshape(3, HW, F)
    w_eff = jnp.einsum("c,ckf->kf", conv_w, fc_w3)                  # (HW, F)
    b_eff = (fc_b + (conv_b @ fc_w3.sum(axis=1))[None, :]).astype(jnp.float32)

    # ---- Tile / pad sizes (128-aligned rows & lanes; K tiles stream the weight) ----
    tk = min(tk, max(128, pl.cdiv(HW, 128) * 128))
    Np = pl.cdiv(N, tm) * tm
    Kp = pl.cdiv(HW, tk) * tk
    x_p = jnp.pad(x2d, ((0, Np - N), (0, Kp - HW))).astype(mat_dt)
    w_p = jnp.pad(w_eff, ((0, Kp - HW), (0, 0))).astype(mat_dt)
    d1w = d1_w.astype(mat_dt)
    d1b = d1_b.astype(jnp.float32)

    grid = (Np // tm, Kp // tk)
    itemsize = 2 if use_bf16 else 4
    n_row_tiles = grid[0]
    cost = pl.CostEstimate(
        flops=2 * Np * Kp * F + 2 * Np * F * E,
        transcendentals=Np,
        bytes_accessed=(Np * Kp * itemsize
                        + Kp * F * itemsize * n_row_tiles   # weights re-streamed per row tile
                        + F * E * itemsize + (F + E) * 4
                        + Np * E * 4),
    )

    out_p = pl.pallas_call(
        margin_net_kernel,
        out_shape=jax.ShapeDtypeStruct((Np, E), jnp.float32),
        grid_spec=pltpu.PrefetchScalarGridSpec(
            num_scalar_prefetch=0,
            grid=grid,
            in_specs=[
                pl.BlockSpec((tm, tk), lambda i, k: (i, k)),   # x tile
                pl.BlockSpec((tk, F), lambda i, k: (k, 0)),    # folded fc weight tile
                pl.BlockSpec((1, F), lambda i, k: (0, 0)),     # folded bias (resident)
                pl.BlockSpec((F, E), lambda i, k: (0, 0)),     # dense1 weight (resident)
                pl.BlockSpec((1, E), lambda i, k: (0, 0)),     # dense1 bias (resident)
            ],
            out_specs=pl.BlockSpec((tm, E), lambda i, k: (i, 0)),
            scratch_shapes=[pltpu.VMEM((tm, F), jnp.float32)],
        ),
        compiler_params=pltpu.CompilerParams(
            dimension_semantics=("parallel", "arbitrary"),
            vmem_limit_bytes=32 * 1024 * 1024,
        ),
        cost_estimate=cost,
    )(x_p, w_p, b_eff, d1w, d1b)

    return out_p[:N]


def init_params(key, hw):
    """Deterministic PyTorch-style uniform(-1/sqrt(fan_in), 1/sqrt(fan_in)) init."""
    ks = jax.random.split(key, 6)

    def u(k, shape, fan_in):
        bound = 1.0 / jnp.sqrt(jnp.float32(fan_in))
        return jax.random.uniform(k, shape, jnp.float32, -bound, bound)

    conv_w = u(ks[0], (3,), 1)                        # Conv2d(1,3,1x1) weight (3,1,1,1) squeezed
    conv_b = u(ks[1], (3,), 1)
    fc_w   = u(ks[2], (3 * hw, BASE_OUT), 3 * hw)     # base_net.fc, pre-transposed (in, out)
    fc_b   = u(ks[3], (1, BASE_OUT), 3 * hw)
    d1_w   = u(ks[4], (BASE_OUT, EMB_DIM), BASE_OUT)  # dense1, pre-transposed (in, out)
    d1_b   = u(ks[5], (1, EMB_DIM), BASE_OUT)
    return conv_w, conv_b, fc_w, fc_b, d1_w, d1_b


def reference_forward(x_nchw, params):
    """Pure-JAX f32 reference of the original (un-folded) math."""
    conv_w, conv_b, fc_w, fc_b, d1_w, d1_b = params
    N, _, H, W = x_nchw.shape
    y = conv_w[None, :, None, None] * x_nchw + conv_b[None, :, None, None]   # (N,3,H,W)
    h = y.reshape(N, -1) @ fc_w + fc_b                                       # (N,F)
    e = h @ d1_w + d1_b                                                      # (N,E)
    n = jnp.sqrt(jnp.sum(e * e, axis=1, keepdims=True))
    return e / jnp.maximum(n, 1e-12)


if __name__ == "__main__":
    key = jax.random.PRNGKey(0)
    k_x, k_p = jax.random.split(key)

    N, H, W = 2, 16, 16
    x = jax.random.normal(k_x, (N, 1, H, W), jnp.float32)
    params = init_params(k_p, H * W)

    out = jax.block_until_ready(margin_net_forward(x, params))
    ref = reference_forward(x, params)

    assert out.shape == (N, EMB_DIM)
    # bf16 matmul operands (f32 accumulation) -> compare against f32 reference
    # with a correspondingly loosened tolerance.
    max_err = float(jnp.max(jnp.abs(out - ref)))
    assert jnp.allclose(out, ref, atol=5e-3, rtol=5e-3), f"mismatch, max abs err {max_err}"

    print("KERNEL_OK")
</pallas_src>

<mosaic_0001>
module attributes {stable_mosaic.version = 11 : i64} {
  func.func @margin_net_kernel(%arg0: i32, %arg1: i32, %arg2: memref<128x256xbf16, #tpu.memory_space<vmem>>, %arg3: memref<256x256xbf16, #tpu.memory_space<vmem>>, %arg4: memref<1x256xf32, #tpu.memory_space<vmem>>, %arg5: memref<256x128xbf16, #tpu.memory_space<vmem>>, %arg6: memref<1x128xf32, #tpu.memory_space<vmem>>, %arg7: memref<128x128xf32, #tpu.memory_space<vmem>>, %arg8: memref<128x256xf32, #tpu.memory_space<vmem>>) attributes {dimension_semantics = [#tpu.dimension_semantics<parallel>, #tpu.dimension_semantics<arbitrary>], iteration_bounds = array<i64: 1, 1>, scalar_prefetch = 0 : i64, scratch_operands = 1 : i64, tpu.core_type = #tpu.core_type<tc>, window_params = [{transform_indices = @transform_0, window_bounds = array<i64: 128, 256>}, {transform_indices = @transform_1, window_bounds = array<i64: 256, 256>}, {pipeline_mode = #tpu.pipeline_mode<synchronous>, transform_indices = @transform_2, window_bounds = array<i64: 1, 256>}, {pipeline_mode = #tpu.pipeline_mode<synchronous>, transform_indices = @transform_3, window_bounds = array<i64: 256, 128>}, {pipeline_mode = #tpu.pipeline_mode<synchronous>, transform_indices = @transform_4, window_bounds = array<i64: 1, 128>}, {transform_indices = @transform_5, window_bounds = array<i64: 128, 128>}]} {
    %c0_i32 = arith.constant 0 : i32
    %0 = arith.cmpi eq, %arg1, %c0_i32 : i32
    %1 = arith.extui %0 : i1 to i32
    %c0_i32_0 = arith.constant 0 : i32
    %2 = arith.cmpi ne, %1, %c0_i32_0 : i32
    scf.if %2 {
      %cst_10 = arith.constant 0.000000e+00 : f32
      %12 = vector.broadcast %cst_10 : f32 to vector<128x256xf32>
      %c0_11 = arith.constant 0 : index
      %c0_12 = arith.constant 0 : index
      %13 = vector.load %arg8[%c0_11, %c0_12] : memref<128x256xf32, #tpu.memory_space<vmem>>, vector<128x256xf32>
      tpu.vector_store %arg8[%c0_11, %c0_12], %12 {strides = array<i32>} : memref<128x256xf32, #tpu.memory_space<vmem>>, vector<128x256xf32>,
    } else {
    }
    %c0 = arith.constant 0 : index
    %c0_1 = arith.constant 0 : index
    %3 = vector.load %arg8[%c0, %c0_1] : memref<128x256xf32, #tpu.memory_space<vmem>>, vector<128x256xf32>
    %c0_2 = arith.constant 0 : index
    %c0_3 = arith.constant 0 : index
    %4 = vector.load %arg2[%c0_2, %c0_3] : memref<128x256xbf16, #tpu.memory_space<vmem>>, vector<128x256xbf16>
    %c0_4 = arith.constant 0 : index
    %c0_5 = arith.constant 0 : index
    %5 = vector.load %arg3[%c0_4, %c0_5] : memref<256x256xbf16, #tpu.memory_space<vmem>>, vector<256x256xbf16>
    %cst = arith.constant dense<0.000000e+00> : vector<128x256xf32>
    %6 = tpu.matmul %4, %5, %cst {dimension_numbers = #tpu.dot_dimension_numbers<[1], [0], [0], [1], [0, 0, 1, 1], [], []>} : vector<128x256xbf16>, vector<256x256xbf16>, vector<128x256xf32> -> vector<128x256xf32>
    %7 = arith.addf %3, %6 : vector<128x256xf32>
    %c0_6 = arith.constant 0 : index
    %c0_7 = arith.constant 0 : index
    %8 = vector.load %arg8[%c0_6, %c0_7] : memref<128x256xf32, #tpu.memory_space<vmem>>, vector<128x256xf32>
    tpu.vector_store %arg8[%c0_6, %c0_7], %7 {strides = array<i32>} : memref<128x256xf32, #tpu.memory_space<vmem>>, vector<128x256xf32>,
    %c0_i32_8 = arith.constant 0 : i32
    %9 = arith.cmpi eq, %arg1, %c0_i32_8 : i32
    %10 = arith.extui %9 : i1 to i32
    %c0_i32_9 = arith.constant 0 : i32
    %11 = arith.cmpi ne, %10, %c0_i32_9 : i32
    scf.if %11 {
      %c0_10 = arith.constant 0 : index
      %c0_11 = arith.constant 0 : index
      %12 = vector.load %arg8[%c0_10, %c0_11] : memref<128x256xf32, #tpu.memory_space<vmem>>, vector<128x256xf32>
      %c0_12 = arith.constant 0 : index
      %c0_13 = arith.constant 0 : index
      %13 = vector.load %arg4[%c0_12, %c0_13] : memref<1x256xf32, #tpu.memory_space<vmem>>, vector<1x256xf32>
      %14 = vector.broadcast %13 : vector<1x256xf32> to vector<128x256xf32>
      %15 = arith.addf %12, %14 : vector<128x256xf32>
      %16 = arith.truncf %15 : vector<128x256xf32> to vector<128x256xbf16>
      %c0_14 = arith.constant 0 : index
      %c0_15 = arith.constant 0 : index
      %17 = vector.load %arg5[%c0_14, %c0_15] : memref<256x128xbf16, #tpu.memory_space<vmem>>, vector<256x128xbf16>
      %cst_16 = arith.constant dense<0.000000e+00> : vector<128x128xf32>
      %18 = tpu.matmul %16, %17, %cst_16 {dimension_numbers = #tpu.dot_dimension_numbers<[1], [0], [0], [1], [0, 0, 1, 1], [], []>} : vector<128x256xbf16>, vector<256x128xbf16>, vector<128x128xf32> -> vector<128x128xf32>
      %c0_17 = arith.constant 0 : index
      %c0_18 = arith.constant 0 : index
      %19 = vector.load %arg6[%c0_17, %c0_18] : memref<1x128xf32, #tpu.memory_space<vmem>>, vector<1x128xf32>
      %20 = vector.broadcast %19 : vector<1x128xf32> to vector<128x128xf32>
      %21 = arith.addf %18, %20 : vector<128x128xf32>
      %22 = arith.mulf %21, %21 : vector<128x128xf32>
      %cst_19 = arith.constant dense<0.000000e+00> : vector<128xf32>
      %23 = vector.multi_reduction <add>, %22, %cst_19 [1] : vector<128x128xf32> to vector<128xf32>
      %24 = vector.shape_cast %23 : vector<128xf32> to vector<128x1xf32>
      %cst_20 = arith.constant 1.000000e-24 : f32
      %25 = vector.broadcast %cst_20 : f32 to vector<128x1xf32>
      %26 = arith.maximumf %24, %25 : vector<128x1xf32>
      %27 = math.rsqrt %26 : vector<128x1xf32>
      %28 = vector.broadcast %27 : vector<128x1xf32> to vector<128x128xf32>
      %29 = arith.mulf %21, %28 : vector<128x128xf32>
      %c0_21 = arith.constant 0 : index
      %c0_22 = arith.constant 0 : index
      %30 = vector.load %arg7[%c0_21, %c0_22] : memref<128x128xf32, #tpu.memory_space<vmem>>, vector<128x128xf32>
      tpu.vector_store %arg7[%c0_21, %c0_22], %29 {strides = array<i32>} : memref<128x128xf32, #tpu.memory_space<vmem>>, vector<128x128xf32>,
    } else {
    }
    return
  }
  func.func @transform_0(%arg0: i32, %arg1: i32) -> (i32, i32) {
    %c0_i32 = arith.constant 0 : i32
    return %arg0, %arg1 : i32, i32
  }
  func.func @transform_1(%arg0: i32, %arg1: i32) -> (i32, i32) {
    %c0_i32 = arith.constant 0 : i32
    %c0_i32_0 = arith.constant 0 : i32
    return %arg1, %c0_i32 : i32, i32
  }
  func.func @transform_2(%arg0: i32, %arg1: i32) -> (i32, i32) {
    %c0_i32 = arith.constant 0 : i32
    %c0_i32_0 = arith.constant 0 : i32
    %c0_i32_1 = arith.constant 0 : i32
    return %c0_i32, %c0_i32_0 : i32, i32
  }
  func.func @transform_3(%arg0: i32, %arg1: i32) -> (i32, i32) {
    %c0_i32 = arith.constant 0 : i32
    %c0_i32_0 = arith.constant 0 : i32
    %c0_i32_1 = arith.constant 0 : i32
    return %c0_i32, %c0_i32_0 : i32, i32
  }
  func.func @transform_4(%arg0: i32, %arg1: i32) -> (i32, i32) {
    %c0_i32 = arith.constant 0 : i32
    %c0_i32_0 = arith.constant 0 : i32
    %c0_i32_1 = arith.constant 0 : i32
    return %c0_i32, %c0_i32_0 : i32, i32
  }
  func.func @transform_5(%arg0: i32, %arg1: i32) -> (i32, i32) {
    %c0_i32 = arith.constant 0 : i32
    %c0_i32_0 = arith.constant 0 : i32
    return %arg0, %c0_i32 : i32, i32
  }
}

</mosaic_0001>

<bundles_post_ra>
// kernel: tpu_custom_call.1
= control target key start
LH: loop header
LB: loop body
LE: loop exit
PB: predicated region body
PF: predicated region fallthrough
CT: control target
= control target key end

     0   :  { %10 = vsyncpa [#allocation4], 0  ;;  %s2067_s0 = inlined_call_operand.hbm [shape: bf16[128,256], index: 0, kind: input, shape index: {}]   ;;  %s2068_s1 = inlined_call_operand.hbm [shape: bf16[256,256], index: 1, kind: input, shape index: {}]   ;;  %s2069_s2 = inlined_call_operand.hbm [shape: f32[1,256], index: 2, kind: input, shape index: {}]   ;;  %s2070_s3 = inlined_call_operand.hbm [shape: bf16[256,128], index: 3, kind: input, shape index: {}]   ;;  %s2071_s4 = inlined_call_operand.vmem [shape: f32[1,128], index: 4, kind: input, shape index: {}]   ;;  %s2072_s5 = inlined_call_operand.hbm [shape: f32[128,128], index: 5, kind: output, shape index: {}]  }
   0x1   :  { %11 = vsyncpa [#allocation7], 0 }
   0x2   :  { %12 = vsyncpa [#allocation10], 0 }
   0x3   :  { %13 = vsyncpa [#allocation5], 0  ;;  %s31_s20 = sshll.u32 %s2068_s1, 4  ;;  %s1800_s21 = smov [#allocation6]   ;;  %s32_s20 = int_to_ptr.hbm [resolvable:$true] %s31_s20 }
   0x4   :  { %s33_s22 = sshll.u32 %s1800_s21, 4  ;;  %s18_s25 = sshll.u32 %s2067_s0, 4  ;;  %s34_s22 = int_to_ptr.vmem [resolvable:$true] %s33_s22  ;;  %s19_s25 = int_to_ptr.hbm [resolvable:$true] %s18_s25 }
   0x5   :  { %s1801_s26 = smov 128   ;;  %s1802_s27 = smov 8  }
   0x6   :  { %39 = dma.hbm_to_vmem [thread:$0]  %s32_s20, 4096, %s34_s22, [#allocation7], %s1801_s26, %s1801_s26, %s1802_s27  }
   0x7   :  { %s1803_s28 = smov [#allocation3]   ;;  %s45_s1 = sshll.u32 %s2069_s2, 4  ;;  %s46_s1 = int_to_ptr.hbm [resolvable:$true] %s45_s1 }
   0x8   :  { %s20_s29 = sshll.u32 %s1803_s28, 4  ;;  %s55_s8 = sshll.u32 %s2070_s3, 4  ;;  %s21_s29 = int_to_ptr.vmem [resolvable:$true] %s20_s29  ;;  %s56_s8 = int_to_ptr.hbm [resolvable:$true] %s55_s8 }
   0x9   :  { %26 = dma.hbm_to_vmem [thread:$0]  %s19_s25, 2048, %s21_s29, [#allocation4], %s1801_s26, %s1801_s26, %s1802_s27  }
   0xa   :  { %s1804_s9 = smov [#allocation8]   ;;  %s1805_s11 = smov [#allocation9]  }
   0xb   :  { %s47_s10 = sshll.u32 %s1804_s9, 4  ;;  %s57_s12 = sshll.u32 %s1805_s11, 4  ;;  %s48_s10 = int_to_ptr.vmem [resolvable:$true] %s47_s10  ;;  %s58_s12 = int_to_ptr.vmem [resolvable:$true] %s57_s12 }
   0xc   :  { %50 = dma.hbm_to_vmem [thread:$0]  %s46_s1, 32, %s48_s10, [#allocation7]  }
   0xd   :  { %s1806_s13 = smov 64   ;;  %s1807_s2 = smov 4  }
   0xe   :  { %63 = dma.hbm_to_vmem [thread:$0]  %s56_s8, 2048, %s58_s12, [#allocation10], %s1806_s13, %s1806_s13, %s1807_s2  }
   0xf   :  { %1792 = dma.done.wait [#allocation4], 2048  }
  0x10   :  { %1793 = vsyncadd [#allocation4], 4294965248 }
  0x11   :  { %1794 = dma.done.wait [#allocation7], 4128  }
  0x12   :  { %1795 = vsyncadd [#allocation7], 4294963168 }
  0x13   :  { %1796 = dma.done.wait [#allocation10], 2048  }
  0x14   :  { %1797 = vsyncadd [#allocation10], 4294965248  ;;  %v1416_v0 = vld [vmem:[#allocation6 + $0x70] sm:$0xf]  ;;  %v1581_v1 = vld [vmem:[#allocation6 + $0x74] sm:$0xf0] }
  0x15   :  { %v1480_v2 = vld [vmem:[#allocation6 + $0xf0] sm:$0xf]  ;;  %v1417_v3 = vor.u32 %v1581_v1, %v1416_v0  ;;  %v1597_v4 = vld [vmem:[#allocation6 + $0xf4] sm:$0xf0]  ;;  %v1408_v5 = vld [vmem:[#allocation6 + $0x60] sm:$0xf] }
  0x16   :  { %v1579_v6 = vld [vmem:[#allocation6 + $0x64] sm:$0xf0]  ;;  %v1481_v7 = vor.u32 %v1597_v4, %v1480_v2  ;;  %v1472_v8 = vld [vmem:[#allocation6 + $0xe0] sm:$0xf]  ;;  %v1400_v12 = vld [vmem:[#allocation6 + $0x50] sm:$0xf] }
  0x17   :  { %v1595_v9 = vld [vmem:[#allocation6 + $0xe4] sm:$0xf0]  ;;  %438 = vmatpush.bf16.msra.mxu0 %v1417_v3  ;;  %1614 = vmatpush.bf16.msra.mxu2 %v1417_v3  ;;  %v1409_v10 = vor.u32 %v1579_v6, %v1408_v5  ;;  %v1577_v13 = vld [vmem:[#allocation6 + $0x54] sm:$0xf0]  ;;  %v1464_v14 = vld [vmem:[#allocation6 + $0xd0] sm:$0xf] }
  0x18   :  { %487 = vmatpush.bf16.msra.mxu1 %v1481_v7  ;;  %1622 = vmatpush.bf16.msra.mxu3 %v1481_v7  ;;  %v1473_v11 = vor.u32 %v1595_v9, %v1472_v8  ;;  %v1593_v15 = vld [vmem:[#allocation6 + $0xd4] sm:$0xf0]  ;;  %v1401_v16 = vor.u32 %v1577_v13, %v1400_v12  ;;  %v1392_v18 = vld [vmem:[#allocation6 + $0x40] sm:$0xf]  ;;  %v1575_v19 = vld [vmem:[#allocation6 + $0x44] sm:$0xf0] }
  0x19   :  { %v1465_v17 = vor.u32 %v1593_v15, %v1464_v14  ;;  %v1456_v20 = vld [vmem:[#allocation6 + $0xc0] sm:$0xf]  ;;  %v1591_v21 = vld [vmem:[#allocation6 + $0xc4] sm:$0xf0]  ;;  %v1393_v22 = vor.u32 %v1575_v19, %v1392_v18  ;;  %v1384_v24 = vld [vmem:[#allocation6 + $0x30] sm:$0xf] }
  0x1a   :  { %v1457_v23 = vor.u32 %v1591_v21, %v1456_v20  ;;  %v1573_v25 = vld [vmem:[#allocation6 + $0x34] sm:$0xf0]  ;;  %v1448_v26 = vld [vmem:[#allocation6 + $0xb0] sm:$0xf]  ;;  %v1376_v30 = vld [vmem:[#allocation6 + $0x20] sm:$0xf] }
  0x1b   :  { %439 = vmatpush.bf16.msra.mxu0 %v1409_v10  ;;  %1615 = vmatpush.bf16.msra.mxu2 %v1409_v10  ;;  %v1589_v27 = vld [vmem:[#allocation6 + $0xb4] sm:$0xf0]  ;;  %v1385_v28 = vor.u32 %v1573_v25, %v1384_v24  ;;  %v1571_v31 = vld [vmem:[#allocation6 + $0x24] sm:$0xf0]  ;;  %v1440_v32 = vld [vmem:[#allocation6 + $0xa0] sm:$0xf] }
  0x1c   :  { %488 = vmatpush.bf16.msra.mxu1 %v1473_v11  ;;  %1623 = vmatpush.bf16.msra.mxu3 %v1473_v11  ;;  %v1449_v29 = vor.u32 %v1589_v27, %v1448_v26  ;;  %v1587_v33 = vld [vmem:[#allocation6 + $0xa4] sm:$0xf0]  ;;  %v1377_v34 = vor.u32 %v1571_v31, %v1376_v30  ;;  %v1368_v36 = vld [vmem:[#allocation6 + $0x10] sm:$0xf]  ;;  %v1569_v37 = vld [vmem:[#allocation6 + $0x14] sm:$0xf0] }
  0x1d   :  { %v1441_v35 = vor.u32 %v1587_v33, %v1440_v32  ;;  %v1432_v38 = vld [vmem:[#allocation6 + $0x90] sm:$0xf]  ;;  %v1585_v39 = vld [vmem:[#allocation6 + $0x94] sm:$0xf0]  ;;  %v1369_v40 = vor.u32 %v1569_v37, %v1368_v36  ;;  %v1360_v41 = vld [vmem:[#allocation6] sm:$0xf] }
  0x1e   :  { %v1433_v42 = vor.u32 %v1585_v39, %v1432_v38  ;;  %v1567_v43 = vld [vmem:[#allocation6 + $0x4] sm:$0xf0]  ;;  %v1424_v44 = vld [vmem:[#allocation6 + $0x80] sm:$0xf]  ;;  %v1580_v48 = vld [vmem:[#allocation6 + $0x74] sm:$0xf] }
  0x1f   :  { %440 = vmatpush.bf16.msra.mxu0 %v1401_v16  ;;  %1616 = vmatpush.bf16.msra.mxu2 %v1401_v16  ;;  %v1583_v45 = vld [vmem:[#allocation6 + $0x84] sm:$0xf0]  ;;  %v1296_v46 = vld [vmem:[#allocation3] sm:$0xf]  ;;  %v1418_v49 = vld [vmem:[#allocation6 + $0x78] sm:$0xf0]  ;;  %v1361_v52 = vor.u32 %v1567_v43, %v1360_v41 }
  0x20   :  { %489 = vmatpush.bf16.msra.mxu1 %v1465_v17  ;;  %1624 = vmatpush.bf16.msra.mxu3 %v1465_v17  ;;  %v1551_v47 = vld [vmem:[#allocation3 + $0x4] sm:$0xf0]  ;;  %v1596_v50 = vld [vmem:[#allocation6 + $0xf4] sm:$0xf]  ;;  %v1482_v51 = vld [vmem:[#allocation6 + $0xf8] sm:$0xf0]  ;;  %v1425_v56 = vor.u32 %v1583_v45, %v1424_v44  ;;  %v1421_v60 = vor.u32 %v1580_v48, %v1418_v49 }
  0x21   :  { %v1328_v53 = vld [vmem:[#allocation3 + $0x40] sm:$0xf]  ;;  %v1559_v54 = vld [vmem:[#allocation3 + $0x44] sm:$0xf0]  ;;  %v1550_v55 = vld [vmem:[#allocation3 + $0x4] sm:$0xf]  ;;  %v1485_v61 = vor.u32 %v1596_v50, %v1482_v51  ;;  %v1857_v63 = vor.u32 %v1551_v47, %v1296_v46 }
  0x22   :  { %v1298_v57 = vld [vmem:[#allocation3 + $0x8] sm:$0xf0]  ;;  %v1558_v58 = vld [vmem:[#allocation3 + $0x44] sm:$0xf]  ;;  %v1859_v0 = vor.u32 %v1559_v54, %v1328_v53  ;;  %v1576_v8 = vld [vmem:[#allocation6 + $0x54] sm:$0xf] }
  0x23   :  { %441 = vmatpush.bf16.msra.mxu0 %v1393_v22  ;;  %1617 = vmatpush.bf16.msra.mxu2 %v1393_v22  ;;  %v1330_v59 = vld [vmem:[#allocation3 + $0x48] sm:$0xf0]  ;;  %v1578_v62 = vld [vmem:[#allocation6 + $0x64] sm:$0xf]  ;;  %v1861_v4 = vor.u32 %v1550_v55, %v1298_v57  ;;  %v1402_v9 = vld [vmem:[#allocation6 + $0x58] sm:$0xf0] }
  0x24   :  { %490 = vmatpush.bf16.msra.mxu1 %v1457_v23  ;;  %1625 = vmatpush.bf16.msra.mxu3 %v1457_v23  ;;  %v1410_v1 = vld [vmem:[#allocation6 + $0x68] sm:$0xf0]  ;;  %v1594_v2 = vld [vmem:[#allocation6 + $0xe4] sm:$0xf]  ;;  %v1863_v5 = vor.u32 %v1558_v58, %v1330_v59  ;;  %v1592_v10 = vld [vmem:[#allocation6 + $0xd4] sm:$0xf]  ;;  %v1405_v12 = vor.u32 %v1576_v8, %v1402_v9 }
  0x25   :  { %v1474_v3 = vld [vmem:[#allocation6 + $0xe8] sm:$0xf0]  ;;  %v1413_v6 = vor.u32 %v1578_v62, %v1410_v1  ;;  %v1466_v11 = vld [vmem:[#allocation6 + $0xd8] sm:$0xf0]  ;;  %v1574_v14 = vld [vmem:[#allocation6 + $0x44] sm:$0xf] }
  0x26   :  { %v1477_v7 = vor.u32 %v1594_v2, %v1474_v3  ;;  %v1469_v13 = vor.u32 %v1592_v10, %v1466_v11  ;;  %v1394_v15 = vld [vmem:[#allocation6 + $0x48] sm:$0xf0]  ;;  %v1590_v16 = vld [vmem:[#allocation6 + $0xc4] sm:$0xf]  ;;  %v1304_v18 = vld [vmem:[#allocation3 + $0x10] sm:$0xf] }
  0x27   :  { %442 = vmatpush.bf16.msra.mxu0 %v1385_v28  ;;  %1618 = vmatpush.bf16.msra.mxu2 %v1385_v28  ;;  %v1458_v17 = vld [vmem:[#allocation6 + $0xc8] sm:$0xf0]  ;;  %v1553_v19 = vld [vmem:[#allocation3 + $0x14] sm:$0xf0]  ;;  %v1397_v20 = vor.u32 %v1574_v14, %v1394_v15  ;;  %v1572_v22 = vld [vmem:[#allocation6 + $0x34] sm:$0xf] }
  0x28   :  { %491 = vmatpush.bf16.msra.mxu1 %v1449_v29  ;;  %1626 = vmatpush.bf16.msra.mxu3 %v1449_v29  ;;  %v1461_v21 = vor.u32 %v1590_v16, %v1458_v17  ;;  %v1386_v23 = vld [vmem:[#allocation6 + $0x38] sm:$0xf0]  ;;  %v1588_v24 = vld [vmem:[#allocation6 + $0xb4] sm:$0xf]  ;;  %v1336_v26 = vld [vmem:[#allocation3 + $0x50] sm:$0xf] }
  0x29   :  { %v1450_v25 = vld [vmem:[#allocation6 + $0xb8] sm:$0xf0]  ;;  %v1561_v27 = vld [vmem:[#allocation3 + $0x54] sm:$0xf0]  ;;  %v1552_v28 = vld [vmem:[#allocation3 + $0x14] sm:$0xf]  ;;  %v1389_v32 = vor.u32 %v1572_v22, %v1386_v23 }
  0x2a   :  { %v1306_v29 = vld [vmem:[#allocation3 + $0x18] sm:$0xf0]  ;;  %v1560_v30 = vld [vmem:[#allocation3 + $0x54] sm:$0xf]  ;;  %v1453_v33 = vor.u32 %v1588_v24, %v1450_v25  ;;  %v1871_v36 = vor.u32 %v1561_v27, %v1336_v26  ;;  %v1378_v37 = vld [vmem:[#allocation6 + $0x28] sm:$0xf0] }
  0x2b   :  { %443 = vmatpush.bf16.msra.mxu0 %v1377_v34  ;;  %1619 = vmatpush.bf16.msra.mxu2 %v1377_v34  ;;  %v1338_v31 = vld [vmem:[#allocation3 + $0x58] sm:$0xf0]  ;;  %v1570_v34 = vld [vmem:[#allocation6 + $0x24] sm:$0xf]  ;;  %v1442_v39 = vld [vmem:[#allocation6 + $0xa8] sm:$0xf0] }
  0x2c   :  { %492 = vmatpush.bf16.msra.mxu1 %v1441_v35  ;;  %1627 = vmatpush.bf16.msra.mxu3 %v1441_v35  ;;  %v1869_v35 = vor.u32 %v1553_v19, %v1304_v18  ;;  %v1586_v38 = vld [vmem:[#allocation6 + $0xa4] sm:$0xf]  ;;  %v1875_v41 = vor.u32 %v1560_v30, %v1338_v31  ;;  %v1568_v44 = vld [vmem:[#allocation6 + $0x14] sm:$0xf]  ;;  %v1370_v45 = vld [vmem:[#allocation6 + $0x18] sm:$0xf0] }
  0x2d   :  { %v1445_v43 = vor.u32 %v1586_v38, %v1442_v39  ;;  %v1584_v46 = vld [vmem:[#allocation6 + $0x94] sm:$0xf]  ;;  %v1434_v47 = vld [vmem:[#allocation6 + $0x98] sm:$0xf0]  ;;  %v1373_v48 = vor.u32 %v1568_v44, %v1370_v45  ;;  %v1566_v50 = vld [vmem:[#allocation6 + $0x4] sm:$0xf] }
  0x2e   :  { %v1437_v49 = vor.u32 %v1584_v46, %v1434_v47  ;;  %v1362_v51 = vld [vmem:[#allocation6 + $0x8] sm:$0xf0]  ;;  %v1555_v57 = vld [vmem:[#allocation3 + $0x24] sm:$0xf0]  ;;  %v1344_v58 = vld [vmem:[#allocation3 + $0x60] sm:$0xf] }
  0x2f   :  { %444 = vmatpush.bf16.msra.mxu0 %v1369_v40  ;;  %1620 = vmatpush.bf16.msra.mxu2 %v1369_v40  ;;  %v1873_v40 = vor.u32 %v1552_v28, %v1306_v29  ;;  %v1426_v53 = vld [vmem:[#allocation6 + $0x88] sm:$0xf0]  ;;  %v1365_v54 = vor.u32 %v1566_v50, %v1362_v51  ;;  %v1563_v59 = vld [vmem:[#allocation3 + $0x64] sm:$0xf0]  ;;  %v1562_v62 = vld [vmem:[#allocation3 + $0x64] sm:$0xf] }
  0x30   :  { %493 = vmatpush.bf16.msra.mxu1 %v1433_v42  ;;  %1628 = vmatpush.bf16.msra.mxu3 %v1433_v42  ;;  %v1381_v42 = vor.u32 %v1570_v34, %v1378_v37  ;;  %v1346_v1 = vld [vmem:[#allocation3 + $0x68] sm:$0xf0]  ;;  %v1881_v3 = vor.u32 %v1563_v59, %v1344_v58  ;;  %v1320_v8 = vld [vmem:[#allocation3 + $0x30] sm:$0xf]  ;;  %v1557_v9 = vld [vmem:[#allocation3 + $0x34] sm:$0xf0] }
  0x31   :  { %v1352_v10 = vld [vmem:[#allocation3 + $0x70] sm:$0xf]  ;;  %v1565_v11 = vld [vmem:[#allocation3 + $0x74] sm:$0xf0]  ;;  %v1564_v14 = vld [vmem:[#allocation3 + $0x74] sm:$0xf]  ;;  %v1321_v16 = vor.u32 %v1557_v9, %v1320_v8 }
  0x32   :  { %v1354_v15 = vld [vmem:[#allocation3 + $0x78] sm:$0xf0]  ;;  %v1887_v17 = vor.u32 %v1565_v11, %v1352_v10  ;;  %v1603_v22 = vld [vmem:[#allocation9 + $0x28] sm:$0xff]  ;;  %v1602_v23 = vld [vmem:[#allocation9 + $0x20] sm:$0xff]  ;;  %s1279_s18 = sshll.u32 %s2072_s5, 4  ;;  %s1280_s18 = int_to_ptr.hbm [resolvable:$true] %s1279_s18 }
  0x33   :  { %445 = vmatpush.bf16.msra.mxu0 %v1361_v52  ;;  %1621 = vmatpush.bf16.msra.mxu2 %v1361_v52  ;;  %v1582_v52 = vld [vmem:[#allocation6 + $0x84] sm:$0xf]  ;;  %v1889_v19 = vor.u32 %v1564_v14, %v1354_v15  ;;  %v1601_v24 = vld [vmem:[#allocation9 + $0x18] sm:$0xff]  ;;  %v1600_v25 = vld [vmem:[#allocation9 + $0x10] sm:$0xff] }
  0x34   :  { %494 = vmatpush.bf16.msra.mxu1 %v1425_v56  ;;  %1629 = vmatpush.bf16.msra.mxu3 %v1425_v56  ;;  %v1429_v55 = vor.u32 %v1582_v52, %v1426_v53  ;;  %v1312_v56 = vld [vmem:[#allocation3 + $0x20] sm:$0xf]  ;;  %v1612_v27 = vld [vmem:[#allocation9 + $0x70] sm:$0xff]  ;;  %v1611_v31 = vld [vmem:[#allocation9 + $0x68] sm:$0xff] }
  0x35   :  { %v1313_v2 = vor.u32 %v1555_v57, %v1312_v56  ;;  %v1613_v26 = vld [vmem:[#allocation9 + $0x78] sm:$0xff]  ;;  %v1607_v11 = vld [vmem:[#allocation9 + $0x48] sm:$0xff] }
  0x36   :  { %446 = vmatmul.bf16.vlgmr.msra.gmra.mxu0 %v1857_v63  ;;  %466 = vmatmul.bf16.vlgmr.msra.gmra.mxu2 %v1859_v0  ;;  %v1897_v30 = vld [vmem:[#allocation8] sm:$0x3] }
  0x37   :  { %536 = vmatpush.bf16.msrb.mxu2 %v1421_v60  ;;  %495 = vmatmul.bf16.vlgmr.msra.gmra.mxu1 %v1861_v4  ;;  %v1554_v60 = vld [vmem:[#allocation3 + $0x24] sm:$0xf]  ;;  %v1609_v51 = vld [vmem:[#allocation9 + $0x58] sm:$0xff] }
  0x38   :  { %585 = vmatpush.bf16.msrb.mxu3 %v1485_v61  ;;  %v1314_v61 = vld [vmem:[#allocation3 + $0x28] sm:$0xf0]  ;;  %968 = vmatpush.bf16.msrb.mxu1 %v1613_v26 }
  0x39   :  { %515 = vmatmul.bf16.vlgmr.msra.gmra.mxu3 %v1863_v5 }
  0x3b   :  { %537 = vmatpush.bf16.msrb.mxu2 %v1413_v6  ;;  %v1317_v6 = vor.u32 %v1554_v60, %v1314_v61 }
  0x3c   :  { %586 = vmatpush.bf16.msrb.mxu3 %v1477_v7  ;;  %v1883_v7 = vor.u32 %v1562_v62, %v1346_v1  ;;  %969 = vmatpush.bf16.msrb.mxu1 %v1612_v27 }
  0x3f   :  { %538 = vmatpush.bf16.msrb.mxu2 %v1405_v12  ;;  %v1556_v12 = vld [vmem:[#allocation3 + $0x34] sm:$0xf] }
  0x40   :  { %587 = vmatpush.bf16.msrb.mxu3 %v1469_v13  ;;  %v1322_v13 = vld [vmem:[#allocation3 + $0x38] sm:$0xf0]  ;;  %970 = vmatpush.bf16.msrb.mxu1 %v1611_v31 }
  0x41   :  { %v1325_v18 = vor.u32 %v1556_v12, %v1322_v13 }
  0x43   :  { %539 = vmatpush.bf16.msrb.mxu2 %v1397_v20  ;;  %v1605_v20 = vld [vmem:[#allocation9 + $0x38] sm:$0xff] }
  0x44   :  { %588 = vmatpush.bf16.msrb.mxu3 %v1461_v21  ;;  %919 = vmatpush.bf16.msrb.mxu0 %v1605_v20  ;;  %v1604_v21 = vld [vmem:[#allocation9 + $0x30] sm:$0xff] }
  0x46   :  { %451 = vmatmul.bf16.gmra.mxu0 %v1869_v35  ;;  %471 = vmatmul.bf16.gmra.mxu2 %v1871_v36 }
  0x47   :  { %540 = vmatpush.bf16.msrb.mxu2 %v1389_v32  ;;  %500 = vmatmul.bf16.gmra.mxu1 %v1873_v40 }
  0x48   :  { %589 = vmatpush.bf16.msrb.mxu3 %v1453_v33  ;;  %920 = vmatpush.bf16.msrb.mxu0 %v1604_v21  ;;  %v1902_v33 = vperm.slane %v1897_v30, 0 }
  0x49   :  { %520 = vmatmul.bf16.gmra.mxu3 %v1875_v41 }
  0x4b   :  { %541 = vmatpush.bf16.msrb.mxu2 %v1381_v42 }
  0x4c   :  { %590 = vmatpush.bf16.msrb.mxu3 %v1445_v43  ;;  %921 = vmatpush.bf16.msrb.mxu0 %v1603_v22 }
  0x4f   :  { %542 = vmatpush.bf16.msrb.mxu2 %v1373_v48 }
  0x50   :  { %591 = vmatpush.bf16.msrb.mxu3 %v1437_v49  ;;  %922 = vmatpush.bf16.msrb.mxu0 %v1602_v23 }
  0x53   :  { %543 = vmatpush.bf16.msrb.mxu2 %v1365_v54 }
  0x54   :  { %592 = vmatpush.bf16.msrb.mxu3 %v1429_v55  ;;  %923 = vmatpush.bf16.msrb.mxu0 %v1601_v24  ;;  %v1606_v24 = vld [vmem:[#allocation9 + $0x40] sm:$0xff] }
  0x56   :  { %456 = vmatmul.bf16.gmra.mxu0 %v1313_v2  ;;  %476 = vmatmul.bf16.gmra.mxu2 %v1881_v3 }
  0x57   :  { %505 = vmatmul.bf16.gmra.mxu1 %v1317_v6 }
  0x58   :  { %924 = vmatpush.bf16.msrb.mxu0 %v1600_v25 }
  0x59   :  { %525 = vmatmul.bf16.gmra.mxu3 %v1883_v7 }
  0x66   :  { %461 = vmatmul.bf16.gmra.mxu0 %v1321_v16  ;;  %481 = vmatmul.bf16.gmra.mxu2 %v1887_v17 }
  0x67   :  { %510 = vmatmul.bf16.gmra.mxu1 %v1325_v18 }
  0x69   :  { %530 = vmatmul.bf16.gmra.mxu3 %v1889_v19 }
  0x76   :  { %544 = vmatmul.bf16.vlgmr.msrb.gmra.mxu2 %v1857_v63  ;;  %v1599_v63 = vld [vmem:[#allocation9 + $0x8] sm:$0xff] }
  0x77   :  { %925 = vmatpush.bf16.msrb.mxu0 %v1599_v63 }
  0x79   :  { %593 = vmatmul.bf16.vlgmr.msrb.gmra.mxu3 %v1861_v4  ;;  %v1598_v4 = vld [vmem:[#allocation9] sm:$0xff] }
  0x7b   :  { %926 = vmatpush.bf16.msrb.mxu0 %v1598_v4 }
  0x86   :  { %549 = vmatmul.bf16.gmra.mxu2 %v1869_v35 }
  0x89   :  { %598 = vmatmul.bf16.gmra.mxu3 %v1873_v40 }
  0x96   :  { %554 = vmatmul.bf16.gmra.mxu2 %v1313_v2 }
  0x99   :  { %603 = vmatmul.bf16.gmra.mxu3 %v1317_v6 }
  0xa6   :  { %559 = vmatmul.bf16.gmra.mxu2 %v1321_v16 }
  0xa9   :  { %608 = vmatmul.bf16.gmra.mxu3 %v1325_v18 }
  0xb3   :  { %v447_v28 = vpop.f32.mrf.mxu0 }
  0xb4   :  { %v496_v29 = vpop.f32.mrf.mxu1 }
  0xb5   :  { %v497_v32 = vadd.f32 %v496_v29, %v447_v28 }
  0xb6   :  { %564 = vmatmul.bf16.gmra.mxu2 %v1859_v0 }
  0xb7   :  { %v739_v40 = vadd.f32 %v1902_v33, %v497_v32 }
  0xb9   :  { %613 = vmatmul.bf16.gmra.mxu3 %v1863_v5  ;;  %v467_v34 = vpop.f32.mrf.mxu2  ;;  %v1610_v5 = vld [vmem:[#allocation9 + $0x60] sm:$0xff] }
  0xba   :  { %971 = vmatpush.bf16.msrb.mxu1 %v1610_v5 }
  0xbb   :  { %v449_v38 = vpop.f32.mrf.mxu0 }
  0xbc   :  { %v516_v35 = vpop.f32.mrf.mxu3  ;;  %v498_v39 = vpop.f32.mrf.mxu1 }
  0xbd   :  { %v517_v37 = vadd.f32 %v516_v35, %v467_v34  ;;  %v499_v43 = vadd.f32 %v498_v39, %v449_v38 }
  0xbe   :  { %972 = vmatpush.bf16.msrb.mxu1 %v1609_v51  ;;  %v1939_v51 = vperm.slane %v1897_v30, 1 }
  0xbf   :  { %v1906_v42 = vadd.f32 %v1902_v33, %v517_v37  ;;  %v741_v0 = vadd.f32 %v1902_v33, %v499_v43 }
  0xc1   :  { %v469_v44 = vpop.f32.mrf.mxu2  ;;  %v771_v45 = vpack.c.bf16 %v741_v0, %v739_v40 }
  0xc3   :  { %927 = vmatmul.bf16.vlgmr.msrb.gmra.mxu0 %v771_v45  ;;  %v452_v48 = vpop.f32.mrf.mxu0 }
  0xc4   :  { %v518_v46 = vpop.f32.mrf.mxu3  ;;  %v501_v49 = vpop.f32.mrf.mxu1 }
  0xc5   :  { %v519_v47 = vadd.f32 %v518_v46, %v469_v44  ;;  %v502_v53 = vadd.f32 %v501_v49, %v452_v48 }
  0xc6   :  { %569 = vmatmul.bf16.gmra.mxu2 %v1871_v36 }
  0xc7   :  { %v1910_v50 = vadd.f32 %v1902_v33, %v519_v47  ;;  %v743_v59 = vadd.f32 %v1902_v33, %v502_v53 }
  0xc9   :  { %618 = vmatmul.bf16.gmra.mxu3 %v1875_v41  ;;  %v779_v52 = vpack.c.bf16 %v1910_v50, %v1906_v42  ;;  %v472_v54 = vpop.f32.mrf.mxu2  ;;  %v1608_v41 = vld [vmem:[#allocation9 + $0x50] sm:$0xff] }
  0xca   :  { %973 = vmatpush.bf16.msrb.mxu1 %v1608_v41 }
  0xcb   :  { %v454_v57 = vpop.f32.mrf.mxu0 }
  0xcc   :  { %v521_v55 = vpop.f32.mrf.mxu3  ;;  %v503_v58 = vpop.f32.mrf.mxu1 }
  0xcd   :  { %v522_v56 = vadd.f32 %v521_v55, %v472_v54  ;;  %v504_v61 = vadd.f32 %v503_v58, %v454_v57 }
  0xce   :  { %974 = vmatpush.bf16.msrb.mxu1 %v1607_v11 }
  0xcf   :  { %v1918_v60 = vadd.f32 %v1902_v33, %v522_v56  ;;  %v745_v36 = vadd.f32 %v1902_v33, %v504_v61 }
  0xd1   :  { %v474_v62 = vpop.f32.mrf.mxu2  ;;  %v773_v1 = vpack.c.bf16 %v745_v36, %v743_v59 }
  0xd2   :  { %975 = vmatpush.bf16.msrb.mxu1 %v1606_v24 }
  0xd3   :  { %932 = vmatmul.bf16.gmra.mxu0 %v773_v1  ;;  %v457_v8 = vpop.f32.mrf.mxu0 }
  0xd4   :  { %v523_v2 = vpop.f32.mrf.mxu3  ;;  %v506_v9 = vpop.f32.mrf.mxu1 }
  0xd5   :  { %v524_v6 = vadd.f32 %v523_v2, %v474_v62  ;;  %v507_v13 = vadd.f32 %v506_v9, %v457_v8 }
  0xd6   :  { %574 = vmatmul.bf16.gmra.mxu2 %v1881_v3 }
  0xd7   :  { %v1922_v10 = vadd.f32 %v1902_v33, %v524_v6  ;;  %v747_v21 = vadd.f32 %v1902_v33, %v507_v13 }
  0xd9   :  { %623 = vmatmul.bf16.gmra.mxu3 %v1883_v7  ;;  %v781_v12 = vpack.c.bf16 %v1922_v10, %v1918_v60  ;;  %v477_v14 = vpop.f32.mrf.mxu2 }
  0xdb   :  { %v459_v18 = vpop.f32.mrf.mxu0 }
  0xdc   :  { %v526_v15 = vpop.f32.mrf.mxu3  ;;  %v508_v20 = vpop.f32.mrf.mxu1 }
  0xdd   :  { %v527_v16 = vadd.f32 %v526_v15, %v477_v14  ;;  %v509_v23 = vadd.f32 %v508_v20, %v459_v18 }
  0xdf   :  { %v763_v22 = vadd.f32 %v1902_v33, %v527_v16  ;;  %v749_v3 = vadd.f32 %v1902_v33, %v509_v23 }
  0xe1   :  { %v479_v7 = vpop.f32.mrf.mxu2  ;;  %v775_v25 = vpack.c.bf16 %v749_v3, %v747_v21 }
  0xe3   :  { %937 = vmatmul.bf16.gmra.mxu0 %v775_v25  ;;  %v462_v26 = vpop.f32.mrf.mxu0 }
  0xe4   :  { %v528_v63 = vpop.f32.mrf.mxu3  ;;  %v511_v27 = vpop.f32.mrf.mxu1 }
  0xe5   :  { %v529_v4 = vadd.f32 %v528_v63, %v479_v7  ;;  %v512_v31 = vadd.f32 %v511_v27, %v462_v26 }
  0xe6   :  { %579 = vmatmul.bf16.gmra.mxu2 %v1887_v17 }
  0xe7   :  { %v765_v28 = vadd.f32 %v1902_v33, %v529_v4  ;;  %v751_v39 = vadd.f32 %v1902_v33, %v512_v31 }
  0xe9   :  { %628 = vmatmul.bf16.gmra.mxu3 %v1889_v19  ;;  %v783_v29 = vpack.c.bf16 %v765_v28, %v763_v22  ;;  %v482_v32 = vpop.f32.mrf.mxu2 }
  0xeb   :  { %v464_v37 = vpop.f32.mrf.mxu0 }
  0xec   :  { %v531_v34 = vpop.f32.mrf.mxu3  ;;  %v513_v38 = vpop.f32.mrf.mxu1 }
  0xed   :  { %v532_v35 = vadd.f32 %v531_v34, %v482_v32  ;;  %v514_v43 = vadd.f32 %v513_v38, %v464_v37 }
  0xef   :  { %v767_v40 = vadd.f32 %v1902_v33, %v532_v35  ;;  %v753_v0 = vadd.f32 %v1902_v33, %v514_v43 }
  0xf1   :  { %v484_v5 = vpop.f32.mrf.mxu2  ;;  %v777_v44 = vpack.c.bf16 %v753_v0, %v751_v39 }
  0xf3   :  { %942 = vmatmul.bf16.gmra.mxu0 %v777_v44 }
  0xf4   :  { %v533_v45 = vpop.f32.mrf.mxu3 }
  0xf5   :  { %v534_v17 = vadd.f32 %v533_v45, %v484_v5 }
  0xf7   :  { %v769_v19 = vadd.f32 %v1902_v33, %v534_v17 }
  0xf9   :  { %v785_v46 = vpack.c.bf16 %v769_v19, %v767_v40  ;;  %v545_v47 = vpop.f32.mrf.mxu2 }
  0xfc   :  { %v594_v48 = vpop.f32.mrf.mxu3 }
  0xfd   :  { %v595_v49 = vadd.f32 %v594_v48, %v545_v47 }
  0xff   :  { %v740_v56 = vadd.f32 %v1939_v51, %v595_v49 }
 0x101   :  { %v547_v53 = vpop.f32.mrf.mxu2 }
 0x103   :  { %947 = vmatmul.bf16.gmra.mxu0 %v779_v52 }
 0x104   :  { %v596_v54 = vpop.f32.mrf.mxu3 }
 0x105   :  { %v597_v55 = vadd.f32 %v596_v54, %v547_v53 }
 0x107   :  { %v742_v57 = vadd.f32 %v1939_v51, %v597_v55 }
 0x109   :  { %v772_v58 = vpack.c.bf16 %v742_v57, %v740_v56  ;;  %v550_v33 = vpop.f32.mrf.mxu2 }
 0x10b   :  { %976 = vmatmul.bf16.vlgmr.msrb.gmra.mxu1 %v772_v58 }
 0x10c   :  { %v599_v59 = vpop.f32.mrf.mxu3 }
 0x10d   :  { %v600_v60 = vadd.f32 %v599_v59, %v550_v33 }
 0x10f   :  { %v744_v41 = vadd.f32 %v1939_v51, %v600_v60 }
 0x111   :  { %v552_v61 = vpop.f32.mrf.mxu2 }
 0x113   :  { %952 = vmatmul.bf16.gmra.mxu0 %v781_v12 }
 0x114   :  { %v601_v36 = vpop.f32.mrf.mxu3 }
 0x115   :  { %v602_v30 = vadd.f32 %v601_v36, %v552_v61  ;;  %v1963_v61 = vld [vmem:[%s2071_s4] ss:$0 sm:$0xff]  ;;  %s1808_s4 = smov [#allocation11]  }
 0x116   :  { %s1277_s15 = sshll.u32 %s1808_s4, 4  ;;  %s1278_s15 = int_to_ptr.vmem [resolvable:$true] %s1277_s15 }
 0x117   :  { %v746_v62 = vadd.f32 %v1939_v51, %v602_v30 }
 0x119   :  { %v774_v1 = vpack.c.bf16 %v746_v62, %v744_v41  ;;  %v555_v42 = vpop.f32.mrf.mxu2 }
 0x11b   :  { %981 = vmatmul.bf16.gmra.mxu1 %v774_v1 }
 0x11c   :  { %v604_v50 = vpop.f32.mrf.mxu3 }
 0x11d   :  { %v605_v52 = vadd.f32 %v604_v50, %v555_v42 }
 0x11f   :  { %v748_v9 = vadd.f32 %v1939_v51, %v605_v52 }
 0x121   :  { %v557_v2 = vpop.f32.mrf.mxu2 }
 0x123   :  { %957 = vmatmul.bf16.gmra.mxu0 %v783_v29 }
 0x124   :  { %v606_v6 = vpop.f32.mrf.mxu3 }
 0x125   :  { %v607_v8 = vadd.f32 %v606_v6, %v557_v2 }
 0x127   :  { %v750_v10 = vadd.f32 %v1939_v51, %v607_v8 }
 0x129   :  { %v776_v11 = vpack.c.bf16 %v750_v10, %v748_v9  ;;  %v560_v12 = vpop.f32.mrf.mxu2 }
 0x12b   :  { %986 = vmatmul.bf16.gmra.mxu1 %v776_v11 }
 0x12c   :  { %v609_v13 = vpop.f32.mrf.mxu3 }
 0x12d   :  { %v610_v14 = vadd.f32 %v609_v13, %v560_v12 }
 0x12f   :  { %v752_v20 = vadd.f32 %v1939_v51, %v610_v14 }
 0x131   :  { %v562_v15 = vpop.f32.mrf.mxu2 }
 0x133   :  { %962 = vmatmul.bf16.gmra.mxu0 %v785_v46 }
 0x134   :  { %v611_v16 = vpop.f32.mrf.mxu3 }
 0x135   :  { %v612_v18 = vadd.f32 %v611_v16, %v562_v15 }
 0x137   :  { %v754_v21 = vadd.f32 %v1939_v51, %v612_v18 }
 0x139   :  { %v778_v22 = vpack.c.bf16 %v754_v21, %v752_v20  ;;  %v565_v23 = vpop.f32.mrf.mxu2 }
 0x13b   :  { %991 = vmatmul.bf16.gmra.mxu1 %v778_v22 }
 0x13c   :  { %v614_v24 = vpop.f32.mrf.mxu3 }
 0x13d   :  { %v615_v3 = vadd.f32 %v614_v24, %v565_v23 }
 0x13f   :  { %v756_v4 = vadd.f32 %v1939_v51, %v615_v3 }
 0x140   :  { %v928_v17 = vpop.f32.mrf.mxu0 }
 0x141   :  { %v567_v7 = vpop.f32.mrf.mxu2  ;;  %v929_v30 = vadd.f32 %v1963_v61, %v928_v17 }
 0x144   :  { %v616_v25 = vpop.f32.mrf.mxu3 }
 0x145   :  { %v617_v63 = vadd.f32 %v616_v25, %v567_v7 }
 0x147   :  { %v758_v26 = vadd.f32 %v1939_v51, %v617_v63 }
 0x148   :  { %v930_v53 = vpop.f32.mrf.mxu0 }
 0x149   :  { %v780_v27 = vpack.c.bf16 %v758_v26, %v756_v4  ;;  %v570_v28 = vpop.f32.mrf.mxu2 }
 0x14b   :  { %996 = vmatmul.bf16.gmra.mxu1 %v780_v27 }
 0x14c   :  { %v619_v29 = vpop.f32.mrf.mxu3 }
 0x14d   :  { %v620_v31 = vadd.f32 %v619_v29, %v570_v28 }
 0x14f   :  { %v760_v37 = vadd.f32 %v1939_v51, %v620_v31 }
 0x150   :  { %v933_v60 = vpop.f32.mrf.mxu0 }
 0x151   :  { %v572_v32 = vpop.f32.mrf.mxu2  ;;  %v934_v6 = vadd.f32 %v1963_v61, %v933_v60 }
 0x154   :  { %v621_v34 = vpop.f32.mrf.mxu3 }
 0x155   :  { %v622_v35 = vadd.f32 %v621_v34, %v572_v32 }
 0x157   :  { %v762_v38 = vadd.f32 %v1939_v51, %v622_v35 }
 0x158   :  { %v935_v36 = vpop.f32.mrf.mxu0 }
 0x159   :  { %v782_v39 = vpack.c.bf16 %v762_v38, %v760_v37  ;;  %v575_v40 = vpop.f32.mrf.mxu2  ;;  %v936_v12 = vadd.f32 %v1963_v61, %v935_v36 }
 0x15b   :  { %1001 = vmatmul.bf16.gmra.mxu1 %v782_v39 }
 0x15c   :  { %v624_v43 = vpop.f32.mrf.mxu3 }
 0x15d   :  { %v625_v0 = vadd.f32 %v624_v43, %v575_v40 }
 0x15f   :  { %v764_v19 = vadd.f32 %v1939_v51, %v625_v0 }
 0x160   :  { %v938_v42 = vpop.f32.mrf.mxu0 }
 0x161   :  { %v577_v5 = vpop.f32.mrf.mxu2  ;;  %v939_v18 = vadd.f32 %v1963_v61, %v938_v42 }
 0x164   :  { %v626_v44 = vpop.f32.mrf.mxu3 }
 0x165   :  { %v627_v45 = vadd.f32 %v626_v44, %v577_v5 }
 0x167   :  { %v766_v46 = vadd.f32 %v1939_v51, %v627_v45 }
 0x168   :  { %v940_v8 = vpop.f32.mrf.mxu0 }
 0x169   :  { %v784_v47 = vpack.c.bf16 %v766_v46, %v764_v19  ;;  %v580_v48 = vpop.f32.mrf.mxu2  ;;  %v941_v24 = vadd.f32 %v1963_v61, %v940_v8 }
 0x16b   :  { %1006 = vmatmul.bf16.gmra.mxu1 %v784_v47 }
 0x16c   :  { %v629_v49 = vpop.f32.mrf.mxu3 }
 0x16d   :  { %v630_v54 = vadd.f32 %v629_v49, %v580_v48 }
 0x16f   :  { %v768_v58 = vadd.f32 %v1939_v51, %v630_v54 }
 0x170   :  { %v943_v15 = vpop.f32.mrf.mxu0 }
 0x171   :  { %v582_v55 = vpop.f32.mrf.mxu2  ;;  %v944_v4 = vadd.f32 %v1963_v61, %v943_v15 }
 0x174   :  { %v631_v56 = vpop.f32.mrf.mxu3 }
 0x175   :  { %v632_v57 = vadd.f32 %v631_v56, %v582_v55 }
 0x177   :  { %v770_v33 = vadd.f32 %v1939_v51, %v632_v57  ;;  %v931_v51 = vadd.f32 %v1963_v61, %v930_v53 }
 0x178   :  { %v945_v23 = vpop.f32.mrf.mxu0 }
 0x179   :  { %v786_v59 = vpack.c.bf16 %v770_v33, %v768_v58  ;;  %v946_v29 = vadd.f32 %v1963_v61, %v945_v23 }
 0x17b   :  { %1011 = vmatmul.bf16.gmra.mxu1 %v786_v59 }
 0x180   :  { %v948_v63 = vpop.f32.mrf.mxu0 }
 0x181   :  { %v949_v37 = vadd.f32 %v1963_v61, %v948_v63 }
 0x188   :  { %v977_v41 = vpop.f32.mrf.mxu1  ;;  %v950_v31 = vpop.f32.mrf.mxu0 }
 0x189   :  { %v1966_v62 = vadd.f32 %v977_v41, %v929_v30  ;;  %v951_v0 = vadd.f32 %v1963_v61, %v950_v31 }
 0x18b   :  { %v1017_v1 = vmul.f32 %v1966_v62, %v1966_v62 }
 0x18d   :  { %1033 = vadd.xlane.f32.xlu0 %v1017_v1 }
 0x190   :  { %v979_v50 = vpop.f32.mrf.mxu1  ;;  %v953_v40 = vpop.f32.mrf.mxu0 }
 0x191   :  { %v1971_v52 = vadd.f32 %v979_v50, %v931_v51  ;;  %v954_v19 = vadd.f32 %v1963_v61, %v953_v40 }
 0x193   :  { %v1018_v2 = vmul.f32 %v1971_v52, %v1971_v52 }
 0x195   :  { %1035 = vadd.xlane.f32.xlu0 %v1018_v2 }
 0x198   :  { %v982_v9 = vpop.f32.mrf.mxu1  ;;  %v955_v17 = vpop.f32.mrf.mxu0 }
 0x199   :  { %v1976_v10 = vadd.f32 %v982_v9, %v934_v6  ;;  %v956_v53 = vadd.f32 %v1963_v61, %v955_v17 }
 0x19b   :  { %v1019_v11 = vmul.f32 %v1976_v10, %v1976_v10 }
 0x19d   :  { %1037 = vadd.xlane.f32.xlu1 %v1019_v11 }
 0x1a0   :  { %v984_v13 = vpop.f32.mrf.mxu1  ;;  %v958_v49 = vpop.f32.mrf.mxu0 }
 0x1a1   :  { %v1981_v14 = vadd.f32 %v984_v13, %v936_v12  ;;  %v959_v57 = vadd.f32 %v1963_v61, %v958_v49 }
 0x1a3   :  { %v1020_v16 = vmul.f32 %v1981_v14, %v1981_v14 }
 0x1a5   :  { %1039 = vadd.xlane.f32.xlu1 %v1020_v16 }
 0x1a8   :  { %v987_v20 = vpop.f32.mrf.mxu1  ;;  %v960_v58 = vpop.f32.mrf.mxu0 }
 0x1a9   :  { %v1986_v21 = vadd.f32 %v987_v20, %v939_v18  ;;  %v961_v36 = vadd.f32 %v1963_v61, %v960_v58 }
 0x1ab   :  { %v1021_v22 = vmul.f32 %v1986_v21, %v1986_v21 }
 0x1ad   :  { %1041 = vadd.xlane.f32.xlu2 %v1021_v22 }
 0x1b0   :  { %v989_v3 = vpop.f32.mrf.mxu1  ;;  %v963_v1 = vpop.f32.mrf.mxu0 }
 0x1b1   :  { %v1991_v7 = vadd.f32 %v989_v3, %v941_v24  ;;  %v964_v51 = vadd.f32 %v1963_v61, %v963_v1 }
 0x1b3   :  { %v1022_v25 = vmul.f32 %v1991_v7, %v1991_v7 }
 0x1b5   :  { %1043 = vadd.xlane.f32.xlu2 %v1022_v25 }
 0x1b8   :  { %v992_v26 = vpop.f32.mrf.mxu1  ;;  %v965_v8 = vpop.f32.mrf.mxu0 }
 0x1b9   :  { %v1996_v27 = vadd.f32 %v992_v26, %v944_v4  ;;  %v966_v9 = vadd.f32 %v1963_v61, %v965_v8 }
 0x1bb   :  { %v1023_v28 = vmul.f32 %v1996_v27, %v1996_v27 }
 0x1bd   :  { %1045 = vadd.xlane.f32.xlu0 %v1023_v28 }
 0x1c0   :  { %v994_v32 = vpop.f32.mrf.mxu1 }
 0x1c1   :  { %v2001_v34 = vadd.f32 %v994_v32, %v946_v29 }
 0x1c3   :  { %v1024_v35 = vmul.f32 %v2001_v34, %v2001_v34 }
 0x1c5   :  { %1047 = vadd.xlane.f32.xlu1 %v1024_v35 }
 0x1c8   :  { %v997_v38 = vpop.f32.mrf.mxu1 }
 0x1c9   :  { %v2006_v39 = vadd.f32 %v997_v38, %v949_v37 }
 0x1cb   :  { %v1025_v43 = vmul.f32 %v2006_v39, %v2006_v39 }
 0x1cd   :  { %1049 = vadd.xlane.f32.xlu2 %v1025_v43 }
 0x1d0   :  { %v999_v5 = vpop.f32.mrf.mxu1 }
 0x1d1   :  { %v2011_v44 = vadd.f32 %v999_v5, %v951_v0 }
 0x1d3   :  { %v1026_v45 = vmul.f32 %v2011_v44, %v2011_v44 }
 0x1d5   :  { %1051 = vadd.xlane.f32.xlu0 %v1026_v45 }
 0x1d8   :  { %v1002_v46 = vpop.f32.mrf.mxu1 }
 0x1d9   :  { %v2016_v47 = vadd.f32 %v1002_v46, %v954_v19 }
 0x1db   :  { %v1027_v48 = vmul.f32 %v2016_v47, %v2016_v47 }
 0x1dd   :  { %1053 = vadd.xlane.f32.xlu1 %v1027_v48 }
 0x1e0   :  { %v1004_v54 = vpop.f32.mrf.mxu1 }
 0x1e1   :  { %v2021_v55 = vadd.f32 %v1004_v54, %v956_v53 }
 0x1e3   :  { %v1028_v56 = vmul.f32 %v2021_v55, %v2021_v55 }
 0x1e5   :  { %1055 = vadd.xlane.f32.xlu2 %v1028_v56 }
 0x1e8   :  { %v1007_v33 = vpop.f32.mrf.mxu1 }
 0x1e9   :  { %v2026_v59 = vadd.f32 %v1007_v33, %v959_v57 }
 0x1eb   :  { %v1029_v60 = vmul.f32 %v2026_v59, %v2026_v59 }
 0x1ed   :  { %1057 = vadd.xlane.f32.xlu0 %v1029_v60 }
 0x1f0   :  { %v1009_v30 = vpop.f32.mrf.mxu1 }
 0x1f1   :  { %v2031_v41 = vadd.f32 %v1009_v30, %v961_v36 }
 0x1f3   :  { %v1030_v42 = vmul.f32 %v2031_v41, %v2031_v41 }
 0x1f5   :  { %1059 = vadd.xlane.f32.xlu1 %v1030_v42 }
 0x1f8   :  { %v1012_v50 = vpop.f32.mrf.mxu1 }
 0x1f9   :  { %v2036_v2 = vadd.f32 %v1012_v50, %v964_v51 }
 0x1fb   :  { %v1031_v6 = vmul.f32 %v2036_v2, %v2036_v2 }
 0x1fd   :  { %1061 = vadd.xlane.f32.xlu2 %v1031_v6 }
 0x200   :  { %v1014_v11 = vpop.f32.mrf.mxu1  ;;  %v1034_v12 = vpop.xlane.xlu0 %1033 }
 0x201   :  { %v2041_v13 = vadd.f32 %v1014_v11, %v966_v9  ;;  %v1065_v15 = vmax.f32 %v1034_v12, 1e-24 }
 0x203   :  { %1640 = vrsqrt.f32 %v1065_v15  ;;  %v1032_v16 = vmul.f32 %v2041_v13, %v2041_v13  ;;  %vm1087_vm1 = vweird.f32 %v1065_v15 }
 0x205   :  { %1063 = vadd.xlane.f32.xlu0 %v1032_v16 }
 0x208   :  { %v1036_v18 = vpop.xlane.xlu0 %1035 }
 0x209   :  { %v1641_v20 = vpop.eup %1640  ;;  %v1066_v22 = vmax.f32 %v1036_v18, 1e-24 }
 0x20a   :  { %v1082_v23 = vmul.f32 %v1641_v20, %v1065_v15  ;;  %vm1088_vm0 = vweird.f32 %v1641_v20 }
 0x20b   :  { %1642 = vrsqrt.f32 %v1066_v22  ;;  %vm1089_vm2 = vmor %vm1087_vm1, %vm1088_vm0  ;;  %vm1097_vm4 = vweird.f32 %v1066_v22 }
 0x20c   :  { %v1083_v24 = vmul.f32 %v1641_v20, %v1082_v23 }
 0x20e   :  { %v1084_v3 = vmul.f32 0.5, %v1083_v24 }
 0x210   :  { %v1085_v25 = vsub.f32 1.5, %v1084_v3  ;;  %v1038_v61 = vpop.xlane.xlu1 %1037 }
 0x211   :  { %v1643_v63 = vpop.eup %1642  ;;  %v1067_v4 = vmax.f32 %v1038_v61, 1e-24 }
 0x212   :  { %v1086_v26 = vmul.f32 %v1641_v20, %v1085_v25  ;;  %v1092_v28 = vmul.f32 %v1643_v63, %v1066_v22  ;;  %vm1098_vm3 = vweird.f32 %v1643_v63 }
 0x213   :  { %1644 = vrsqrt.f32 %v1067_v4  ;;  %vm1099_vm5 = vmor %vm1097_vm4, %vm1098_vm3  ;;  %vm1107_vm7 = vweird.f32 %v1067_v4 }
 0x214   :  { %v1090_v29 = vsel %vm1089_vm2, %v1641_v20, %v1086_v26  ;;  %v1093_v31 = vmul.f32 %v1643_v63, %v1092_v28 }
 0x215   :  { %v1241_v32 = vmul.f32 %v1090_v29, %v1966_v62 }
 0x216   :  { %v1094_v35 = vmul.f32 0.5, %v1093_v31 }
 0x217   :  { %1257 = vst [vmem:[#allocation11] sm:$0xff] %v1241_v32 }
 0x218   :  { %v1095_v37 = vsub.f32 1.5, %v1094_v35  ;;  %v1040_v38 = vpop.xlane.xlu1 %1039 }
 0x219   :  { %v1645_v40 = vpop.eup %1644  ;;  %v1068_v43 = vmax.f32 %v1040_v38, 1e-24 }
 0x21a   :  { %v1096_v0 = vmul.f32 %v1643_v63, %v1095_v37  ;;  %v1102_v5 = vmul.f32 %v1645_v40, %v1067_v4  ;;  %vm1108_vm6 = vweird.f32 %v1645_v40 }
 0x21b   :  { %1646 = vrsqrt.f32 %v1068_v43  ;;  %vm1109_vm8 = vmor %vm1107_vm7, %vm1108_vm6  ;;  %vm1117_vm10 = vweird.f32 %v1068_v43 }
 0x21c   :  { %v1100_v45 = vsel %vm1099_vm5, %v1643_v63, %v1096_v0  ;;  %v1103_v17 = vmul.f32 %v1645_v40, %v1102_v5 }
 0x21d   :  { %v1242_v19 = vmul.f32 %v1100_v45, %v1971_v52 }
 0x21e   :  { %v1104_v46 = vmul.f32 0.5, %v1103_v17 }
 0x21f   :  { %1258 = vst [vmem:[#allocation11 + $0x8] sm:$0xff] %v1242_v19 }
 0x220   :  { %v1105_v48 = vsub.f32 1.5, %v1104_v46  ;;  %v1042_v62 = vpop.xlane.xlu2 %1041 }
 0x221   :  { %v1647_v49 = vpop.eup %1646  ;;  %v1069_v53 = vmax.f32 %v1042_v62, 1e-24 }
 0x222   :  { %v1106_v54 = vmul.f32 %v1645_v40, %v1105_v48  ;;  %v1112_v56 = vmul.f32 %v1647_v49, %v1068_v43  ;;  %vm1118_vm9 = vweird.f32 %v1647_v49 }
 0x223   :  { %1648 = vrsqrt.f32 %v1069_v53  ;;  %vm1119_vm11 = vmor %vm1117_vm10, %vm1118_vm9  ;;  %vm1127_vm13 = vweird.f32 %v1069_v53 }
 0x224   :  { %v1110_v57 = vsel %vm1109_vm8, %v1645_v40, %v1106_v54  ;;  %v1113_v58 = vmul.f32 %v1647_v49, %v1112_v56 }
 0x225   :  { %v1243_v33 = vmul.f32 %v1110_v57, %v1976_v10 }
 0x226   :  { %v1114_v60 = vmul.f32 0.5, %v1113_v58 }
 0x227   :  { %1259 = vst [vmem:[#allocation11 + $0x10] sm:$0xff] %v1243_v33 }
 0x228   :  { %v1115_v36 = vsub.f32 1.5, %v1114_v60  ;;  %v1044_v52 = vpop.xlane.xlu2 %1043 }
 0x229   :  { %v1649_v30 = vpop.eup %1648  ;;  %v1070_v1 = vmax.f32 %v1044_v52, 1e-24 }
 0x22a   :  { %v1116_v42 = vmul.f32 %v1647_v49, %v1115_v36  ;;  %v1122_v51 = vmul.f32 %v1649_v30, %v1069_v53  ;;  %vm1128_vm12 = vweird.f32 %v1649_v30 }
 0x22b   :  { %1650 = vrsqrt.f32 %v1070_v1  ;;  %vm1129_vm14 = vmor %vm1127_vm13, %vm1128_vm12  ;;  %vm1137_vm0 = vweird.f32 %v1070_v1 }
 0x22c   :  { %v1120_v50 = vsel %vm1119_vm11, %v1647_v49, %v1116_v42  ;;  %v1123_v6 = vmul.f32 %v1649_v30, %v1122_v51 }
 0x22d   :  { %v1244_v8 = vmul.f32 %v1120_v50, %v1981_v14 }
 0x22e   :  { %v1124_v9 = vmul.f32 0.5, %v1123_v6 }
 0x22f   :  { %1260 = vst [vmem:[#allocation11 + $0x18] sm:$0xff] %v1244_v8 }
 0x230   :  { %v1125_v11 = vsub.f32 1.5, %v1124_v9  ;;  %v1046_v10 = vpop.xlane.xlu0 %1045 }
 0x231   :  { %v1651_v12 = vpop.eup %1650  ;;  %v1071_v15 = vmax.f32 %v1046_v10, 1e-24 }
 0x232   :  { %v1126_v16 = vmul.f32 %v1649_v30, %v1125_v11  ;;  %v1132_v18 = vmul.f32 %v1651_v12, %v1070_v1  ;;  %vm1138_vm15 = vweird.f32 %v1651_v12 }
 0x233   :  { %1652 = vrsqrt.f32 %v1071_v15  ;;  %vm1139_vm1 = vmor %vm1137_vm0, %vm1138_vm15  ;;  %vm1147_vm3 = vweird.f32 %v1071_v15 }
 0x234   :  { %v1130_v20 = vsel %vm1129_vm14, %v1649_v30, %v1126_v16  ;;  %v1133_v22 = vmul.f32 %v1651_v12, %v1132_v18 }
 0x235   :  { %v1245_v23 = vmul.f32 %v1130_v20, %v1986_v21 }
 0x236   :  { %v1134_v24 = vmul.f32 0.5, %v1133_v22 }
 0x237   :  { %1261 = vst [vmem:[#allocation11 + $0x20] sm:$0xff] %v1245_v23 }
 0x238   :  { %v1135_v3 = vsub.f32 1.5, %v1134_v24  ;;  %v1048_v14 = vpop.xlane.xlu1 %1047 }
 0x239   :  { %v1653_v25 = vpop.eup %1652  ;;  %v1072_v61 = vmax.f32 %v1048_v14, 1e-24 }
 0x23a   :  { %v1136_v63 = vmul.f32 %v1651_v12, %v1135_v3  ;;  %v1142_v4 = vmul.f32 %v1653_v25, %v1071_v15  ;;  %vm1148_vm2 = vweird.f32 %v1653_v25 }
 0x23b   :  { %1654 = vrsqrt.f32 %v1072_v61  ;;  %vm1149_vm4 = vmor %vm1147_vm3, %vm1148_vm2  ;;  %vm1157_vm6 = vweird.f32 %v1072_v61 }
 0x23c   :  { %v1140_v26 = vsel %vm1139_vm1, %v1651_v12, %v1136_v63  ;;  %v1143_v28 = vmul.f32 %v1653_v25, %v1142_v4 }
 0x23d   :  { %v1246_v29 = vmul.f32 %v1140_v26, %v1991_v7 }
 0x23e   :  { %v1144_v31 = vmul.f32 0.5, %v1143_v28 }
 0x23f   :  { %1262 = vst [vmem:[#allocation11 + $0x28] sm:$0xff] %v1246_v29 }
 0x240   :  { %v1145_v32 = vsub.f32 1.5, %v1144_v31  ;;  %v1050_v21 = vpop.xlane.xlu2 %1049 }
 0x241   :  { %v1655_v35 = vpop.eup %1654  ;;  %v1073_v37 = vmax.f32 %v1050_v21, 1e-24 }
 0x242   :  { %v1146_v38 = vmul.f32 %v1653_v25, %v1145_v32  ;;  %v1152_v40 = vmul.f32 %v1655_v35, %v1072_v61  ;;  %vm1158_vm5 = vweird.f32 %v1655_v35 }
 0x243   :  { %1656 = vrsqrt.f32 %v1073_v37  ;;  %vm1159_vm7 = vmor %vm1157_vm6, %vm1158_vm5  ;;  %vm1167_vm9 = vweird.f32 %v1073_v37 }
 0x244   :  { %v1150_v43 = vsel %vm1149_vm4, %v1653_v25, %v1146_v38  ;;  %v1153_v0 = vmul.f32 %v1655_v35, %v1152_v40 }
 0x245   :  { %v1247_v5 = vmul.f32 %v1150_v43, %v1996_v27 }
 0x246   :  { %v1154_v45 = vmul.f32 0.5, %v1153_v0 }
 0x247   :  { %1263 = vst [vmem:[#allocation11 + $0x30] sm:$0xff] %v1247_v5 }
 0x248   :  { %v1155_v17 = vsub.f32 1.5, %v1154_v45  ;;  %v1052_v7 = vpop.xlane.xlu0 %1051 }
 0x249   :  { %v1657_v19 = vpop.eup %1656  ;;  %v1074_v46 = vmax.f32 %v1052_v7, 1e-24 }
 0x24a   :  { %v1156_v48 = vmul.f32 %v1655_v35, %v1155_v17  ;;  %v1162_v62 = vmul.f32 %v1657_v19, %v1073_v37  ;;  %vm1168_vm8 = vweird.f32 %v1657_v19 }
 0x24b   :  { %1658 = vrsqrt.f32 %v1074_v46  ;;  %vm1169_vm10 = vmor %vm1167_vm9, %vm1168_vm8  ;;  %vm1177_vm12 = vweird.f32 %v1074_v46 }
 0x24c   :  { %v1160_v49 = vsel %vm1159_vm7, %v1655_v35, %v1156_v48  ;;  %v1163_v53 = vmul.f32 %v1657_v19, %v1162_v62 }
 0x24d   :  { %v1248_v54 = vmul.f32 %v1160_v49, %v2001_v34 }
 0x24e   :  { %v1164_v56 = vmul.f32 0.5, %v1163_v53 }
 0x24f   :  { %1264 = vst [vmem:[#allocation11 + $0x38] sm:$0xff] %v1248_v54 }
 0x250   :  { %v1165_v57 = vsub.f32 1.5, %v1164_v56  ;;  %v1054_v27 = vpop.xlane.xlu1 %1053 }
 0x251   :  { %v1659_v58 = vpop.eup %1658  ;;  %v1075_v33 = vmax.f32 %v1054_v27, 1e-24 }
 0x252   :  { %v1166_v60 = vmul.f32 %v1657_v19, %v1165_v57  ;;  %v1172_v36 = vmul.f32 %v1659_v58, %v1074_v46  ;;  %vm1178_vm11 = vweird.f32 %v1659_v58 }
 0x253   :  { %1660 = vrsqrt.f32 %v1075_v33  ;;  %vm1179_vm13 = vmor %vm1177_vm12, %vm1178_vm11  ;;  %vm1187_vm15 = vweird.f32 %v1075_v33 }
 0x254   :  { %v1170_v52 = vsel %vm1169_vm10, %v1657_v19, %v1166_v60  ;;  %v1173_v30 = vmul.f32 %v1659_v58, %v1172_v36 }
 0x255   :  { %v1249_v1 = vmul.f32 %v1170_v52, %v2006_v39 }
 0x256   :  { %v1174_v42 = vmul.f32 0.5, %v1173_v30 }
 0x257   :  { %1265 = vst [vmem:[#allocation11 + $0x40] sm:$0xff] %v1249_v1 }
 0x258   :  { %v1175_v51 = vsub.f32 1.5, %v1174_v42  ;;  %v1056_v34 = vpop.xlane.xlu2 %1055 }
 0x259   :  { %v1661_v50 = vpop.eup %1660  ;;  %v1076_v6 = vmax.f32 %v1056_v34, 1e-24 }
 0x25a   :  { %v1176_v8 = vmul.f32 %v1659_v58, %v1175_v51  ;;  %v1182_v9 = vmul.f32 %v1661_v50, %v1075_v33  ;;  %vm1188_vm14 = vweird.f32 %v1661_v50 }
 0x25b   :  { %1662 = vrsqrt.f32 %v1076_v6  ;;  %vm1189_vm0 = vmor %vm1187_vm15, %vm1188_vm14  ;;  %vm1197_vm2 = vweird.f32 %v1076_v6 }
 0x25c   :  { %v1180_v11 = vsel %vm1179_vm13, %v1659_v58, %v1176_v8  ;;  %v1183_v10 = vmul.f32 %v1661_v50, %v1182_v9 }
 0x25d   :  { %v1250_v12 = vmul.f32 %v1180_v11, %v2011_v44 }
 0x25e   :  { %v1184_v15 = vmul.f32 0.5, %v1183_v10 }
 0x25f   :  { %1266 = vst [vmem:[#allocation11 + $0x48] sm:$0xff] %v1250_v12 }
 0x260   :  { %v1185_v16 = vsub.f32 1.5, %v1184_v15  ;;  %v1058_v39 = vpop.xlane.xlu0 %1057 }
 0x261   :  { %v1663_v18 = vpop.eup %1662  ;;  %v1077_v20 = vmax.f32 %v1058_v39, 1e-24 }
 0x262   :  { %v1186_v22 = vmul.f32 %v1661_v50, %v1185_v16  ;;  %v1192_v23 = vmul.f32 %v1663_v18, %v1076_v6  ;;  %vm1198_vm1 = vweird.f32 %v1663_v18 }
 0x263   :  { %1664 = vrsqrt.f32 %v1077_v20  ;;  %vm1199_vm3 = vmor %vm1197_vm2, %vm1198_vm1  ;;  %vm1207_vm5 = vweird.f32 %v1077_v20 }
 0x264   :  { %v1190_v24 = vsel %vm1189_vm0, %v1661_v50, %v1186_v22  ;;  %v1193_v3 = vmul.f32 %v1663_v18, %v1192_v23 }
 0x265   :  { %v1251_v14 = vmul.f32 %v1190_v24, %v2016_v47 }
 0x266   :  { %v1194_v25 = vmul.f32 0.5, %v1193_v3 }
 0x267   :  { %1267 = vst [vmem:[#allocation11 + $0x50] sm:$0xff] %v1251_v14 }
 0x268   :  { %v1195_v61 = vsub.f32 1.5, %v1194_v25  ;;  %v1060_v44 = vpop.xlane.xlu1 %1059 }
 0x269   :  { %v1665_v63 = vpop.eup %1664  ;;  %v1078_v4 = vmax.f32 %v1060_v44, 1e-24 }
 0x26a   :  { %v1196_v26 = vmul.f32 %v1663_v18, %v1195_v61  ;;  %v1202_v28 = vmul.f32 %v1665_v63, %v1077_v20  ;;  %vm1208_vm4 = vweird.f32 %v1665_v63 }
 0x26b   :  { %1666 = vrsqrt.f32 %v1078_v4  ;;  %vm1209_vm6 = vmor %vm1207_vm5, %vm1208_vm4  ;;  %vm1217_vm8 = vweird.f32 %v1078_v4 }
 0x26c   :  { %v1200_v29 = vsel %vm1199_vm3, %v1663_v18, %v1196_v26  ;;  %v1203_v31 = vmul.f32 %v1665_v63, %v1202_v28 }
 0x26d   :  { %v1252_v32 = vmul.f32 %v1200_v29, %v2021_v55 }
 0x26e   :  { %v1204_v21 = vmul.f32 0.5, %v1203_v31 }
 0x26f   :  { %1268 = vst [vmem:[#allocation11 + $0x58] sm:$0xff] %v1252_v32 }
 0x270   :  { %v1205_v35 = vsub.f32 1.5, %v1204_v21  ;;  %v1062_v47 = vpop.xlane.xlu2 %1061 }
 0x271   :  { %v1667_v37 = vpop.eup %1666  ;;  %v1079_v38 = vmax.f32 %v1062_v47, 1e-24 }
 0x272   :  { %v1206_v40 = vmul.f32 %v1665_v63, %v1205_v35  ;;  %v1212_v43 = vmul.f32 %v1667_v37, %v1078_v4  ;;  %vm1218_vm7 = vweird.f32 %v1667_v37 }
 0x273   :  { %1668 = vrsqrt.f32 %v1079_v38  ;;  %vm1219_vm9 = vmor %vm1217_vm8, %vm1218_vm7  ;;  %vm1227_vm11 = vweird.f32 %v1079_v38 }
 0x274   :  { %v1210_v0 = vsel %vm1209_vm6, %v1665_v63, %v1206_v40  ;;  %v1213_v5 = vmul.f32 %v1667_v37, %v1212_v43 }
 0x275   :  { %v1253_v45 = vmul.f32 %v1210_v0, %v2026_v59 }
 0x276   :  { %v1214_v17 = vmul.f32 0.5, %v1213_v5 }
 0x277   :  { %1269 = vst [vmem:[#allocation11 + $0x60] sm:$0xff] %v1253_v45 }
 0x278   :  { %v1215_v7 = vsub.f32 1.5, %v1214_v17  ;;  %v1064_v55 = vpop.xlane.xlu0 %1063 }
 0x279   :  { %v1669_v19 = vpop.eup %1668  ;;  %v1080_v46 = vmax.f32 %v1064_v55, 1e-24 }
 0x27a   :  { %v1216_v48 = vmul.f32 %v1667_v37, %v1215_v7  ;;  %v1222_v62 = vmul.f32 %v1669_v19, %v1079_v38  ;;  %vm1228_vm10 = vweird.f32 %v1669_v19 }
 0x27b   :  { %1670 = vrsqrt.f32 %v1080_v46  ;;  %vm1229_vm12 = vmor %vm1227_vm11, %vm1228_vm10  ;;  %vm1237_vm14 = vweird.f32 %v1080_v46 }
 0x27c   :  { %v1220_v49 = vsel %vm1219_vm9, %v1667_v37, %v1216_v48  ;;  %v1223_v53 = vmul.f32 %v1669_v19, %v1222_v62 }
 0x27d   :  { %v1254_v54 = vmul.f32 %v1220_v49, %v2031_v41 }
 0x27e   :  { %v1224_v56 = vmul.f32 0.5, %v1223_v53 }
 0x27f   :  { %1270 = vst [vmem:[#allocation11 + $0x68] sm:$0xff] %v1254_v54 }
 0x280   :  { %v1225_v57 = vsub.f32 1.5, %v1224_v56 }
 0x281   :  { %v1671_v59 = vpop.eup %1670 }
 0x282   :  { %v1226_v27 = vmul.f32 %v1669_v19, %v1225_v57  ;;  %v1232_v58 = vmul.f32 %v1671_v59, %v1080_v46  ;;  %vm1238_vm13 = vweird.f32 %v1671_v59 }
 0x283   :  { %vm1239_vm15 = vmor %vm1237_vm14, %vm1238_vm13 }
 0x284   :  { %v1230_v33 = vsel %vm1229_vm12, %v1669_v19, %v1226_v27  ;;  %v1233_v60 = vmul.f32 %v1671_v59, %v1232_v58 }
 0x285   :  { %v1255_v36 = vmul.f32 %v1230_v33, %v2036_v2 }
 0x286   :  { %v1234_v52 = vmul.f32 0.5, %v1233_v60 }
 0x287   :  { %1271 = vst [vmem:[#allocation11 + $0x70] sm:$0xff] %v1255_v36 }
 0x288   :  { %v1235_v30 = vsub.f32 1.5, %v1234_v52 }
 0x28a   :  { %v1236_v1 = vmul.f32 %v1671_v59, %v1235_v30 }
 0x28c   :  { %v1240_v41 = vsel %vm1239_vm15, %v1671_v59, %v1236_v1 }
 0x28d   :  { %v1256_v42 = vmul.f32 %v1240_v41, %v2041_v13 }
 0x28f   :  { %1272 = vst [vmem:[#allocation11 + $0x78] sm:$0xff] %v1256_v42 }
 0x290   :  { %1285 = dma.vmem_to_hbm [thread:$0]  %s1278_s15, 2048, %s1280_s18, [#allocation5], %s1801_s26, %s1801_s26, %s1802_s27  }
 0x291   :  { %1798 = dma.done.wait [#allocation5], 2048  }
 0x292   :  { %1799 = vsyncadd [#allocation5], 4294965248 }
 0x293   :  { %1290 = vsyncpa [#allocation4], 1 }
 0x294   :  { %1291 = vsyncpa [#allocation7], 1 }
 0x295   :  { %1292 = vsyncpa [#allocation10], 1 }
 0x296   :  { %1293 = vsyncpa [#allocation5], 1 }

</bundles_post_ra>
